<compile_context>
chip_gen: v6e
topology: v6e:2x2x1
jax: 0.10.0
libtpu: 0.0.40
codegen_flags: <defaults>
</compile_context>

<pallas_src>
import jax
import jax.numpy as jnp
from jax.experimental import pallas as pl
from jax.experimental.pallas import tpu as pltpu


# Contract the last dim of both operands (A @ B^T), same dimension numbers the
# TPU flash-attention kernels use for q @ k^T.
_TRANS_B = (((1,), (1,)), ((), ()))


# ------------------------- Pallas kernel (MLP hot path) -----------------------
def _make_mlp_kernel(n_rest):
    """NeuMF MLP kernel: 1 split input layer + n_rest further hidden layers + output."""

    def kernel(*refs):
        xu_ref, xi_ref, w0u_ref, w0i_ref, b0_ref = refs[:5]
        hid_refs = refs[5:5 + 2 * n_rest]
        wo_ref, bo_ref, out_ref = refs[5 + 2 * n_rest:]

        # First hidden layer, computed transposed (fuses the concat of the
        # reference module):  h = relu(W0u @ xu^T + W0i @ xi^T + b0)   -> [H1, TB]
        h = jax.lax.dot_general(w0u_ref[...], xu_ref[...], _TRANS_B,
                                preferred_element_type=jnp.float32)
        h = h + jax.lax.dot_general(w0i_ref[...], xi_ref[...], _TRANS_B,
                                    preferred_element_type=jnp.float32)
        h = jnp.maximum(h + b0_ref[...], 0.0)

        # Remaining hidden layers; batch stays on the 128-lane axis.
        for j in range(n_rest):
            w_ref, b_ref = hid_refs[2 * j], hid_refs[2 * j + 1]
            h = jnp.dot(w_ref[...], h, preferred_element_type=jnp.float32) + b_ref[...]
            h = jnp.maximum(h, 0.0)                                   # [H_{j+1}, TB]

        # Final affine (H_last -> 1): VPU multiply + sublane reduce, no MXU push;
        # result is already a lane-dense row.
        logits = jnp.sum(h * wo_ref[...], axis=0, keepdims=True) + bo_ref[...]   # [1, TB]
        out_ref[...] = jax.nn.sigmoid(logits)[None].astype(out_ref.dtype)        # [1, 1, TB]

    return kernel


def _mlp_pallas(user_emb, item_emb, w0u_t, w0i_t, b0, hidden, wo, bo, *, tile_b):
    """user_emb/item_emb: [Bp, F] with Bp % tile_b == 0.  Returns ratings [Bp, 1] f32."""
    Bp, F = user_emb.shape
    assert Bp % tile_b == 0
    TB = tile_b
    nt = Bp // TB

    resident = lambda a: pl.BlockSpec(a.shape, lambda i: (0, 0))  # VMEM-resident weights

    in_specs = [
        pl.BlockSpec((TB, F), lambda i: (i, 0)),   # user embedding tile
        pl.BlockSpec((TB, F), lambda i: (i, 0)),   # item embedding tile
        resident(w0u_t), resident(w0i_t), resident(b0),
        *[resident(a) for a in hidden],
        resident(wo), resident(bo),
    ]
    out_spec = pl.BlockSpec((1, 1, TB), lambda i: (i, 0, 0))   # lane-dense output rows

    n_rest = len(hidden) // 2
    out = pl.pallas_call(
        _make_mlp_kernel(n_rest),
        out_shape=jax.ShapeDtypeStruct((nt, 1, TB), jnp.float32),
        grid_spec=pltpu.PrefetchScalarGridSpec(
            num_scalar_prefetch=0,
            grid=(nt,),
            in_specs=in_specs,
            out_specs=out_spec,
        ),
        compiler_params=pltpu.CompilerParams(
            dimension_semantics=("parallel",),   # v7x megacore: shard batch tiles
        ),
    )(user_emb, item_emb, w0u_t, w0i_t, b0, *hidden, wo, bo)
    return out.reshape(Bp, 1)


# ------------------------------ Model wrapper ---------------------------------
def _round_up(x, m):
    return pl.cdiv(x, m) * m


def _pad_indices(idx, n):
    pad = n - idx.shape[0]
    if pad == 0:
        return idx
    return jnp.concatenate([idx, jnp.zeros((pad,), idx.dtype)])


def multi_layer_perceptron_forward(params, user_indices, item_indices, *, block_b=512):
    """NeuMF MLP forward: rating [B, 1] = sigmoid(MLP(concat(emb_u, emb_i)))."""
    assert block_b % 8 == 0
    B = user_indices.shape[0]
    F = params["emb_user"].shape[1]

    # Tile the batch; pad the (tiny) index vectors rather than the activations.
    TB = _round_up(B, 8) if B <= block_b else block_b
    Bp = _round_up(B, TB)
    user_idx = _pad_indices(user_indices, Bp)
    item_idx = _pad_indices(item_indices, Bp)

    # Embedding row-gathers (contiguous 4*F-byte rows); the concat is fused into
    # the kernel's first layer, so no [B, 2F] intermediate ever hits HBM.
    user_emb = params["emb_user"][user_idx]        # [Bp, F]
    item_emb = params["emb_item"][item_idx]        # [Bp, F]

    # Tiny per-layer operands, transposed so the batch axis is lane-major inside
    # the kernel.  All stay VMEM-resident across the batch grid.
    fc_w, fc_b = params["fc_w"], params["fc_b"]
    w0 = fc_w[0]                                   # [2F, H1]
    w0u_t = w0[:F].T                               # [H1, F]
    w0i_t = w0[F:].T                               # [H1, F]
    b0 = fc_b[0].reshape(-1, 1)                    # [H1, 1]
    hidden = []
    for w, b in zip(fc_w[1:], fc_b[1:]):
        hidden.append(w.T)                         # [H_out, H_in]
        hidden.append(b.reshape(-1, 1))            # [H_out, 1]
    wo = params["wo"].reshape(-1, 1)               # [H_last, 1]
    bo = params["bo"].reshape(1, 1)                # [1, 1]

    ratings = _mlp_pallas(user_emb, item_emb, w0u_t, w0i_t, b0, hidden, wo, bo,
                          tile_b=TB)               # [Bp, 1]
    return ratings[:B]


def init_params(key, num_users, num_items, factor_num, layers):
    """Deterministic synthetic init (shapes match the nn.Module __init__)."""
    assert layers[0] == 2 * factor_num, "NeuMF convention: layers[0] == 2 * factor_num"
    n_fc = len(layers) - 1
    keys = jax.random.split(key, 4 + 2 * n_fc)
    p = {
        "emb_user": jax.random.normal(keys[0], (num_users, factor_num), jnp.float32),
        "emb_item": jax.random.normal(keys[1], (num_items, factor_num), jnp.float32),
        "fc_w": [], "fc_b": [],
    }
    k = 2
    for in_size, out_size in zip(layers[:-1], layers[1:]):
        bound = 1.0 / float(in_size) ** 0.5
        p["fc_w"].append(jax.random.uniform(keys[k], (in_size, out_size),
                                            jnp.float32, -bound, bound))
        p["fc_b"].append(jax.random.uniform(keys[k + 1], (out_size,),
                                            jnp.float32, -bound, bound))
        k += 2
    bound = 1.0 / float(layers[-1]) ** 0.5
    p["wo"] = jax.random.uniform(keys[k], (layers[-1], 1), jnp.float32, -bound, bound)
    p["bo"] = jax.random.uniform(keys[k + 1], (1,), jnp.float32, -bound, bound)
    return p


# Pure-JAX reference (mirrors the PyTorch forward exactly).
def reference_forward(params, user_indices, item_indices):
    u = params["emb_user"][user_indices]
    it = params["emb_item"][item_indices]
    v = jnp.concatenate([u, it], axis=-1)
    for w, b in zip(params["fc_w"], params["fc_b"]):
        v = jax.nn.relu(v @ w + b)
    return jax.nn.sigmoid(v @ params["wo"] + params["bo"])


if __name__ == "__main__":
    # Small NeuMF-consistent config: layers[0] == 2 * factor_num.
    factor_num = 16
    layers = [32, 16, 8]
    num_users, num_items = 64, 48
    batch = 300   # not a multiple of the tile -> exercises the index-padding path

    key = jax.random.PRNGKey(0)
    kp, ku, ki = jax.random.split(key, 3)
    params = init_params(kp, num_users, num_items, factor_num, layers)
    user_idx = jax.random.randint(ku, (batch,), 0, num_users, dtype=jnp.int32)
    item_idx = jax.random.randint(ki, (batch,), 0, num_items, dtype=jnp.int32)

    # Multi-tile batch grid (3 tiles of 128 rows; last tile padded via indices).
    out_tiled = jax.block_until_ready(
        multi_layer_perceptron_forward(params, user_idx, item_idx, block_b=128))
    # Single-block path (whole batch in one tile).
    out_single = jax.block_until_ready(
        multi_layer_perceptron_forward(params, user_idx, item_idx, block_b=512))

    ref = jax.block_until_ready(reference_forward(params, user_idx, item_idx))

    assert out_tiled.shape == (batch, 1)
    assert jnp.allclose(out_tiled, ref, atol=1e-5, rtol=1e-4)
    assert jnp.allclose(out_single, ref, atol=1e-5, rtol=1e-4)
    print("KERNEL_OK")
</pallas_src>

<mosaic_0001>
module attributes {stable_mosaic.version = 11 : i64} {
  func.func @kernel(%arg0: i32, %arg1: memref<128x16xf32, #tpu.memory_space<vmem>>, %arg2: memref<128x16xf32, #tpu.memory_space<vmem>>, %arg3: memref<16x16xf32, #tpu.memory_space<vmem>>, %arg4: memref<16x16xf32, #tpu.memory_space<vmem>>, %arg5: memref<16x1xf32, #tpu.memory_space<vmem>>, %arg6: memref<8x16xf32, #tpu.memory_space<vmem>>, %arg7: memref<8x1xf32, #tpu.memory_space<vmem>>, %arg8: memref<8x1xf32, #tpu.memory_space<vmem>>, %arg9: memref<1x1xf32, #tpu.memory_space<vmem>>, %arg10: memref<1x1x128xf32, #tpu.memory_space<vmem>>) attributes {dimension_semantics = [#tpu.dimension_semantics<parallel>], iteration_bounds = array<i64: 3>, scalar_prefetch = 0 : i64, scratch_operands = 0 : i64, tpu.core_type = #tpu.core_type<tc>, window_params = [{transform_indices = @transform_0, window_bounds = array<i64: 128, 16>}, {transform_indices = @transform_1, window_bounds = array<i64: 128, 16>}, {pipeline_mode = #tpu.pipeline_mode<synchronous>, transform_indices = @transform_2, window_bounds = array<i64: 16, 16>}, {pipeline_mode = #tpu.pipeline_mode<synchronous>, transform_indices = @transform_3, window_bounds = array<i64: 16, 16>}, {pipeline_mode = #tpu.pipeline_mode<synchronous>, transform_indices = @transform_4, window_bounds = array<i64: 16, 1>}, {pipeline_mode = #tpu.pipeline_mode<synchronous>, transform_indices = @transform_5, window_bounds = array<i64: 8, 16>}, {pipeline_mode = #tpu.pipeline_mode<synchronous>, transform_indices = @transform_6, window_bounds = array<i64: 8, 1>}, {pipeline_mode = #tpu.pipeline_mode<synchronous>, transform_indices = @transform_7, window_bounds = array<i64: 8, 1>}, {pipeline_mode = #tpu.pipeline_mode<synchronous>, transform_indices = @transform_8, window_bounds = array<i64: 1, 1>}, {transform_indices = @transform_9, window_bounds = array<i64: 1, 1, 128>}]} {
    %c0 = arith.constant 0 : index
    %c0_0 = arith.constant 0 : index
    %0 = vector.load %arg3[%c0, %c0_0] : memref<16x16xf32, #tpu.memory_space<vmem>>, vector<16x16xf32>
    %c0_1 = arith.constant 0 : index
    %c0_2 = arith.constant 0 : index
    %1 = vector.load %arg1[%c0_1, %c0_2] : memref<128x16xf32, #tpu.memory_space<vmem>>, vector<128x16xf32>
    %cst = arith.constant dense<0.000000e+00> : vector<16x128xf32>
    %2 = tpu.matmul %0, %1, %cst {dimension_numbers = #tpu.dot_dimension_numbers<[1], [1], [0], [0], [0, 0, 1, 0], [], []>} : vector<16x16xf32>, vector<128x16xf32>, vector<16x128xf32> -> vector<16x128xf32>
    %c0_3 = arith.constant 0 : index
    %c0_4 = arith.constant 0 : index
    %3 = vector.load %arg4[%c0_3, %c0_4] : memref<16x16xf32, #tpu.memory_space<vmem>>, vector<16x16xf32>
    %c0_5 = arith.constant 0 : index
    %c0_6 = arith.constant 0 : index
    %4 = vector.load %arg2[%c0_5, %c0_6] : memref<128x16xf32, #tpu.memory_space<vmem>>, vector<128x16xf32>
    %cst_7 = arith.constant dense<0.000000e+00> : vector<16x128xf32>
    %5 = tpu.matmul %3, %4, %cst_7 {dimension_numbers = #tpu.dot_dimension_numbers<[1], [1], [0], [0], [0, 0, 1, 0], [], []>} : vector<16x16xf32>, vector<128x16xf32>, vector<16x128xf32> -> vector<16x128xf32>
    %6 = arith.addf %2, %5 : vector<16x128xf32>
    %c0_8 = arith.constant 0 : index
    %c0_9 = arith.constant 0 : index
    %7 = vector.load %arg5[%c0_8, %c0_9] : memref<16x1xf32, #tpu.memory_space<vmem>>, vector<16x1xf32>
    %8 = vector.broadcast %7 : vector<16x1xf32> to vector<16x128xf32>
    %9 = arith.addf %6, %8 : vector<16x128xf32>
    %cst_10 = arith.constant 0.000000e+00 : f32
    %10 = vector.broadcast %cst_10 : f32 to vector<16x128xf32>
    %11 = arith.maximumf %9, %10 : vector<16x128xf32>
    %c0_11 = arith.constant 0 : index
    %c0_12 = arith.constant 0 : index
    %12 = vector.load %arg6[%c0_11, %c0_12] : memref<8x16xf32, #tpu.memory_space<vmem>>, vector<8x16xf32>
    %cst_13 = arith.constant dense<0.000000e+00> : vector<8x128xf32>
    %13 = tpu.matmul %12, %11, %cst_13 {dimension_numbers = #tpu.dot_dimension_numbers<[1], [0], [0], [1], [0, 0, 1, 1], [], []>} : vector<8x16xf32>, vector<16x128xf32>, vector<8x128xf32> -> vector<8x128xf32>
    %c0_14 = arith.constant 0 : index
    %c0_15 = arith.constant 0 : index
    %14 = vector.load %arg7[%c0_14, %c0_15] : memref<8x1xf32, #tpu.memory_space<vmem>>, vector<8x1xf32>
    %15 = vector.broadcast %14 : vector<8x1xf32> to vector<8x128xf32>
    %16 = arith.addf %13, %15 : vector<8x128xf32>
    %cst_16 = arith.constant 0.000000e+00 : f32
    %17 = vector.broadcast %cst_16 : f32 to vector<8x128xf32>
    %18 = arith.maximumf %16, %17 : vector<8x128xf32>
    %c0_17 = arith.constant 0 : index
    %c0_18 = arith.constant 0 : index
    %19 = vector.load %arg8[%c0_17, %c0_18] : memref<8x1xf32, #tpu.memory_space<vmem>>, vector<8x1xf32>
    %20 = vector.broadcast %19 : vector<8x1xf32> to vector<8x128xf32>
    %21 = arith.mulf %18, %20 : vector<8x128xf32>
    %cst_19 = arith.constant dense<0.000000e+00> : vector<128xf32>
    %22 = vector.multi_reduction <add>, %21, %cst_19 [0] : vector<8x128xf32> to vector<128xf32>
    %23 = vector.shape_cast %22 : vector<128xf32> to vector<1x128xf32>
    %c0_20 = arith.constant 0 : index
    %c0_21 = arith.constant 0 : index
    %24 = vector.load %arg9[%c0_20, %c0_21] : memref<1x1xf32, #tpu.memory_space<vmem>>, vector<1x1xf32>
    %25 = vector.broadcast %24 : vector<1x1xf32> to vector<1x128xf32>
    %26 = arith.addf %23, %25 : vector<1x128xf32>
    %27 = arith.negf %26 : vector<1x128xf32>
    %28 = math.exp %27 : vector<1x128xf32>
    %cst_22 = arith.constant 1.000000e+00 : f32
    %29 = vector.broadcast %cst_22 : f32 to vector<1x128xf32>
    %30 = arith.addf %29, %28 : vector<1x128xf32>
    %31 = arith.divf %29, %30 : vector<1x128xf32>
    %32 = vector.shape_cast %31 : vector<1x128xf32> to vector<1x1x128xf32>
    %c0_23 = arith.constant 0 : index
    %c0_24 = arith.constant 0 : index
    %c0_25 = arith.constant 0 : index
    %33 = vector.load %arg10[%c0_23, %c0_24, %c0_25] : memref<1x1x128xf32, #tpu.memory_space<vmem>>, vector<1x1x128xf32>
    tpu.vector_store %arg10[%c0_23, %c0_24, %c0_25], %32 {strides = array<i32>} : memref<1x1x128xf32, #tpu.memory_space<vmem>>, vector<1x1x128xf32>,
    return
  }
  func.func @transform_0(%arg0: i32) -> (i32, i32) {
    %c0_i32 = arith.constant 0 : i32
    %c0_i32_0 = arith.constant 0 : i32
    return %arg0, %c0_i32 : i32, i32
  }
  func.func @transform_1(%arg0: i32) -> (i32, i32) {
    %c0_i32 = arith.constant 0 : i32
    %c0_i32_0 = arith.constant 0 : i32
    return %arg0, %c0_i32 : i32, i32
  }
  func.func @transform_2(%arg0: i32) -> (i32, i32) {
    %c0_i32 = arith.constant 0 : i32
    %c0_i32_0 = arith.constant 0 : i32
    %c0_i32_1 = arith.constant 0 : i32
    return %c0_i32, %c0_i32_0 : i32, i32
  }
  func.func @transform_3(%arg0: i32) -> (i32, i32) {
    %c0_i32 = arith.constant 0 : i32
    %c0_i32_0 = arith.constant 0 : i32
    %c0_i32_1 = arith.constant 0 : i32
    return %c0_i32, %c0_i32_0 : i32, i32
  }
  func.func @transform_4(%arg0: i32) -> (i32, i32) {
    %c0_i32 = arith.constant 0 : i32
    %c0_i32_0 = arith.constant 0 : i32
    %c0_i32_1 = arith.constant 0 : i32
    return %c0_i32, %c0_i32_0 : i32, i32
  }
  func.func @transform_5(%arg0: i32) -> (i32, i32) {
    %c0_i32 = arith.constant 0 : i32
    %c0_i32_0 = arith.constant 0 : i32
    %c0_i32_1 = arith.constant 0 : i32
    return %c0_i32, %c0_i32_0 : i32, i32
  }
  func.func @transform_6(%arg0: i32) -> (i32, i32) {
    %c0_i32 = arith.constant 0 : i32
    %c0_i32_0 = arith.constant 0 : i32
    %c0_i32_1 = arith.constant 0 : i32
    return %c0_i32, %c0_i32_0 : i32, i32
  }
  func.func @transform_7(%arg0: i32) -> (i32, i32) {
    %c0_i32 = arith.constant 0 : i32
    %c0_i32_0 = arith.constant 0 : i32
    %c0_i32_1 = arith.constant 0 : i32
    return %c0_i32, %c0_i32_0 : i32, i32
  }
  func.func @transform_8(%arg0: i32) -> (i32, i32) {
    %c0_i32 = arith.constant 0 : i32
    %c0_i32_0 = arith.constant 0 : i32
    %c0_i32_1 = arith.constant 0 : i32
    return %c0_i32, %c0_i32_0 : i32, i32
  }
  func.func @transform_9(%arg0: i32) -> (i32, i32, i32) {
    %c0_i32 = arith.constant 0 : i32
    %c0_i32_0 = arith.constant 0 : i32
    %c0_i32_1 = arith.constant 0 : i32
    return %arg0, %c0_i32, %c0_i32_0 : i32, i32, i32
  }
}

</mosaic_0001>

<bundles_post_ra>
// kernel: tpu_custom_call.1
= control target key start
LH: loop header
LB: loop body
LE: loop exit
PB: predicated region body
PF: predicated region fallthrough
CT: control target
= control target key end

     0   :  { %s1418_s0 = inlined_call_operand.vmem [shape: f32[384,16], index: 0, kind: input, shape index: {}]   ;;  %s1419_s1 = inlined_call_operand.vmem [shape: f32[384,16], index: 1, kind: input, shape index: {}]   ;;  %s1420_s2 = inlined_call_operand.vmem [shape: f32[16,16], index: 2, kind: input, shape index: {}]   ;;  %s1421_s3 = inlined_call_operand.vmem [shape: f32[16,16], index: 3, kind: input, shape index: {}]   ;;  %s1422_s4 = inlined_call_operand.vmem [shape: f32[16,1], index: 4, kind: input, shape index: {}]   ;;  %s1423_s5 = inlined_call_operand.vmem [shape: f32[8,16], index: 5, kind: input, shape index: {}]   ;;  %s1424_s6 = inlined_call_operand.vmem [shape: f32[8,1], index: 6, kind: input, shape index: {}]   ;;  %s1425_s7 = inlined_call_operand.vmem [shape: f32[8,1], index: 7, kind: input, shape index: {}]   ;;  %s1426_s8 = inlined_call_operand.<no memory space> [shape: f32[1,1], index: 8, kind: input, shape index: {}]   ;;  %s1427_s9 = inlined_call_operand.hbm [shape: f32[3,1,128], index: 9, kind: output, shape index: {}]  }
   0x1   :  { %v14_v0 = vstv %s1426_s8 }
   0x2   :  { %15 = vst [vmem:[#allocation2] sm:$0x1] %v14_v0 }
   0x3   :  { %16 = vsyncpa [#allocation4], 0 }
   0x4   :  { %18 = vsyncpa [#allocation4 + $0x1], 0  ;;  %s1191_s11 = smov 0   ;;  %s1193_s12 = smov 0  }
   0x5   :  { %s1195_s13 = smov 0   ;;  %s1197_s14 = smov 0  }
   0x6 LB: > { %s858_s8 = sadd.s32 4294967295, %s1132_s14   ;;  %s859_s15 = sadd.s32 4294967294, %s1132_s14   ;;  %s1132_s14 = sphi %s1197_s14, %s1433_s14   ;;  %s1128_s13 = sphi %s1195_s13, %s1432_s13   ;;  %s1124_s12 = sphi %s1193_s12, %s1431_s12   ;;  %s1120_s11 = sphi %s1191_s11, %s1430_s11  }
   0x7   : > { %s1214_s16 = sadd.s32 1, %s1132_s14   ;;  %s230_s17 = sadd.s32 1, %s1128_s13 }
   0x8   : > { %s227_s18 = ssub.s32 %s1132_s14, %s1214_s16  ;;  %p240_p0 = scmp.ne.s32.totalorder %s1128_s13, %s1124_s12 }
   0x9   : > { %p228_p1 = scmp.eq.s32.totalorder %s227_s18, 0  ;;  %p241_p2 = scmp.eq.s32.totalorder %s858_s8, 2 }
   0xa   : > { %p246_p3 = scmp.ne.s32.totalorder %s1124_s12, %s1120_s11  ;;  %p247_p4 = scmp.eq.s32.totalorder %s859_s15, 2 }
   0xb   : > { %s1224_s19 = scalar_select %p228_p1, %s1128_s13, %s230_s17  }
   0xc   : > { %p1226_p5 = por %p241_p2, %p240_p0  ;;  %p1230_p6 = por %p247_p4, %p246_p3 }
   0xd   : > { %p862_p7 = scmp.ge.s32.totalorder %s1132_s14, 1  ;;  %p304_p8 = scmp.lt.s32.totalorder %s1132_s14, 4 }
   0xf   : > { %p305_p9 = pnand %p862_p7, %p304_p8 }
  0x10   : > { %s1236_s22 = sshll.u32 (!%p305_p9), %s858_s8, 4  ;;  %s342_s23 = sand.u32 (!%p305_p9), 1, %s1124_s12  }
  0x11   : > { %308 = sbr.rel (%p305_p9) target bundleno = 552 (0x228), region = 56  ;;  %p345_p10 = scmp.lt.s32.totalorder (!%p305_p9), %s1236_s22, 47 }
  0x12   : > { %s343_s24 = scalar_lea.vmem (!%p305_p9), [#allocation3], %s342_s23  ;;  %s1383_s28 = scalar_lea.hbm (!%p305_p9), %s1427_s9, %s1236_s22 }
  0x13   : > { %s1137_s10 = smov (!%p305_p9), [#allocation3]  }
  0x16   : > { %vm392_vm0 = vcmask 130048   ;;  %v374_v1 = vld [vmem:[%s1421_s3] sm:$0xff]  ;;  %v652_v3 = vld [vmem:[%s1422_s4 + $0x8] sm:$0xff]  ;;  %v1134_v4 = vmov 0   ;;  %s346_s29 = scalar_select %p345_p10, %s1236_s22, 47  ;;  %v1135_v41 = vmov 0.0   ;;  %v767_v63 = vlaneseq }
  0x17   : > { %v356_v2 = vld [vmem:[%s1420_s2] sm:$0xff]  ;;  %979 = vmatprep.mubr.msk.f32.mxu0 %vm392_vm0, %v374_v1  ;;  %1066 = vset.pattern.permute.xlu0 %v1134_v4  ;;  %v375_v39 = vld [vmem:[%s1421_s3 + $0x8] sm:$0xff]  ;;  %vm1136_vm1 = vmmov 0  }
  0x18   : > { %1014 = vmatprep.mubr.msk.f32.mxu1 %vm392_vm0, %v356_v2  ;;  %1067 = vset.pattern.permute.xlu1 %v1134_v4  ;;  %v651_v5 = vld [vmem:[%s1422_s4] sm:$0xff]  ;;  %s864_s8 = sshll.u32 %s346_s29, 3  ;;  %v357_v40 = vld [vmem:[%s1420_s2 + $0x8] sm:$0xff]  ;;  %v768_v2 = vshrl.u32 %v767_v63, 7  ;;  %s780_s29 = scalar_lea.sflag [#allocation4], %s342_s23 }
  0x19   : > { %660 = vperm.xlu0 %1066, %v652_v3   ;;  %s1257_s18 = scalar_lea.vmem %s1419_s1, %s864_s8  ;;  %s1262_s25 = scalar_lea.vmem %s1418_s0, %s864_s8  ;;  %v761_v10 = vld [vmem:[#allocation2] sm:$0x1] }
  0x1a   : > { %v391_v6 = vld [vmem:[%s1257_s18 + $0x78] sm:$0xff]  ;;  %v390_v8 = vld [vmem:[%s1257_s18 + $0x70] sm:$0xff]  ;;  %v389_v11 = vld [vmem:[%s1257_s18 + $0x68] sm:$0xff]  ;;  %s1076_s8 = sshll.u32 %s1137_s10, 4  ;;  %s1077_s8 = int_to_ptr.vmem [resolvable:$false] %s1076_s8 }
  0x1b   : > { %v373_v7 = vld [vmem:[%s1262_s25 + $0x78] sm:$0xff]  ;;  %947 = vmatprep.subr.msk.mxu0 %vm392_vm0, %v391_v6  ;;  %v372_v9 = vld [vmem:[%s1262_s25 + $0x70] sm:$0xff]  ;;  %v371_v12 = vld [vmem:[%s1262_s25 + $0x68] sm:$0xff]  ;;  %s1078_s15 = scalar_lea.vmem %s1077_s8, 32 }
  0x1c   : > { %982 = vmatprep.subr.msk.mxu1 %vm392_vm0, %v373_v7  ;;  %948 = vmatpush3.xpose.msk.msra.mxu0 %vm392_vm0, %v391_v6  ;;  %v388_v13 = vld [vmem:[%s1257_s18 + $0x60] sm:$0xff]  ;;  %v387_v15 = vld [vmem:[%s1257_s18 + $0x58] sm:$0xff]  ;;  %v386_v17 = vld [vmem:[%s1257_s18 + $0x50] sm:$0xff] }
  0x1d   : > { %655 = vperm.xlu0 %1066, %v651_v5   ;;  %983 = vmatpush3.xpose.msk.msra.mxu1 %vm392_vm0, %v373_v7  ;;  %v370_v14 = vld [vmem:[%s1262_s25 + $0x60] sm:$0xff]  ;;  %v369_v16 = vld [vmem:[%s1262_s25 + $0x58] sm:$0xff]  ;;  %v368_v18 = vld [vmem:[%s1262_s25 + $0x50] sm:$0xff]  ;;  %v769_v5 = vsub.s32 0, %v768_v2 }
  0x1e   : > { %949 = vmatprep.subr.msk.mxu0 %vm392_vm0, %v390_v8  ;;  %984 = vmatprep.subr.msk.mxu1 %vm392_vm0, %v372_v9  ;;  %v385_v19 = vld [vmem:[%s1257_s18 + $0x48] sm:$0xff]  ;;  %v384_v21 = vld [vmem:[%s1257_s18 + $0x40] sm:$0xff]  ;;  %v383_v23 = vld [vmem:[%s1257_s18 + $0x38] sm:$0xff] }
  0x1f   : > { %v367_v20 = vld [vmem:[%s1262_s25 + $0x48] sm:$0xff]  ;;  %v366_v22 = vld [vmem:[%s1262_s25 + $0x40] sm:$0xff]  ;;  %v365_v24 = vld [vmem:[%s1262_s25 + $0x38] sm:$0xff] }
  0x20   : > { %950 = vmatpush3.xpose.msk.msra.mxu0 %vm392_vm0, %v390_v8  ;;  %v382_v25 = vld [vmem:[%s1257_s18 + $0x30] sm:$0xff]  ;;  %v381_v27 = vld [vmem:[%s1257_s18 + $0x28] sm:$0xff]  ;;  %v380_v29 = vld [vmem:[%s1257_s18 + $0x20] sm:$0xff] }
  0x21   : > { %764 = vperm.xlu0 %1066, %v761_v10   ;;  %985 = vmatpush3.xpose.msk.msra.mxu1 %vm392_vm0, %v372_v9  ;;  %v364_v26 = vld [vmem:[%s1262_s25 + $0x30] sm:$0xff]  ;;  %v363_v28 = vld [vmem:[%s1262_s25 + $0x28] sm:$0xff]  ;;  %v362_v30 = vld [vmem:[%s1262_s25 + $0x20] sm:$0xff] }
  0x22   : > { %951 = vmatprep.subr.msk.mxu0 %vm392_vm0, %v389_v11  ;;  %986 = vmatprep.subr.msk.mxu1 %vm392_vm0, %v371_v12  ;;  %v379_v31 = vld [vmem:[%s1257_s18 + $0x18] sm:$0xff]  ;;  %v378_v33 = vld [vmem:[%s1257_s18 + $0x10] sm:$0xff]  ;;  %v377_v35 = vld [vmem:[%s1257_s18 + $0x8] sm:$0xff] }
  0x23   : > { %v361_v32 = vld [vmem:[%s1262_s25 + $0x18] sm:$0xff]  ;;  %v360_v34 = vld [vmem:[%s1262_s25 + $0x10] sm:$0xff]  ;;  %v359_v36 = vld [vmem:[%s1262_s25 + $0x8] sm:$0xff] }
  0x24   : > { %952 = vmatpush3.xpose.msk.msra.mxu0 %vm392_vm0, %v389_v11  ;;  %v376_v37 = vld [vmem:[%s1257_s18] sm:$0xff] }
  0x25   : > { %987 = vmatpush3.xpose.msk.msra.mxu1 %vm392_vm0, %v371_v12  ;;  %953 = vmatprep.subr.msk.mxu0 %vm392_vm0, %v388_v13  ;;  %v358_v38 = vld [vmem:[%s1262_s25] sm:$0xff]  ;;  %s792_s25 = sshll.u32 %s343_s24, 4  ;;  %s793_s25 = int_to_ptr.vmem [resolvable:$true] %s792_s25 }
  0x26   : > { %988 = vmatprep.subr.msk.mxu1 %vm392_vm0, %v370_v14  ;;  %v668_v42 = vld [vmem:[%s1424_s6] sm:$0xff]  ;;  %s1072_s30 = scalar_lea.vmem %s793_s25, 16  ;;  %p1079_p0 = scmp.lt.s32.totalorder %s793_s25, %s1077_s8 }
  0x27   : > { %671 = vperm.xlu1 %1067, %v668_v42   ;;  %v748_v43 = vld [vmem:[%s1425_s7] sm:$0xff]  ;;  %p1073_p11 = scmp.ne.s32.totalorder %s793_s25, %s1072_s30  ;;  %p1080_p1 = scmp.lt.s32.totalorder %s1078_s15, %s1072_s30 }
  0x28   : > { %954 = vmatpush3.xpose.msk.msra.mxu0 %vm392_vm0, %v388_v13  ;;  %v667_v56 = vld [vmem:[%s1423_s5] sm:$0xff] }
  0x29   : > { %989 = vmatpush3.xpose.msk.msra.mxu1 %vm392_vm0, %v370_v14  ;;  %955 = vmatprep.subr.msk.mxu0 %vm392_vm0, %v387_v15  ;;  %p1074_p12 = pnand %p1073_p11, %p1226_p5  ;;  %p1081_p2 = por %p1080_p1, %p1079_p0 }
  0x2a   : > { %990 = vmatprep.subr.msk.mxu1 %vm392_vm0, %v369_v16 }
  0x2b   : > { %751 = vperm.xlu1 %1067, %v748_v43   ;;  %p1075_p13 = pneg %p1074_p12 }
  0x2c   : > { %956 = vmatpush3.xpose.msk.msra.mxu0 %vm392_vm0, %v387_v15 }
  0x2d   : > { %991 = vmatpush3.xpose.msk.msra.mxu1 %vm392_vm0, %v369_v16  ;;  %957 = vmatprep.subr.msk.mxu0 %vm392_vm0, %v386_v17  ;;  %p1082_p3 = pnand %p1081_p2, %p1075_p13 }
  0x2e   : > { %992 = vmatprep.subr.msk.mxu1 %vm392_vm0, %v368_v18 }
  0x30   : > { %958 = vmatpush3.xpose.msk.msra.mxu0 %vm392_vm0, %v386_v17 }
  0x31   : > { %993 = vmatpush3.xpose.msk.msra.mxu1 %vm392_vm0, %v368_v18  ;;  %959 = vmatprep.subr.msk.mxu0 %vm392_vm0, %v385_v19 }
  0x32   : > { %994 = vmatprep.subr.msk.mxu1 %vm392_vm0, %v367_v20 }
  0x34   : > { %960 = vmatpush3.xpose.msk.msra.mxu0 %vm392_vm0, %v385_v19 }
  0x35   : > { %995 = vmatpush3.xpose.msk.msra.mxu1 %vm392_vm0, %v367_v20  ;;  %961 = vmatprep.subr.msk.mxu0 %vm392_vm0, %v384_v21 }
  0x36   : > { %996 = vmatprep.subr.msk.mxu1 %vm392_vm0, %v366_v22 }
  0x38   : > { %962 = vmatpush3.xpose.msk.msra.mxu0 %vm392_vm0, %v384_v21 }
  0x39   : > { %997 = vmatpush3.xpose.msk.msra.mxu1 %vm392_vm0, %v366_v22  ;;  %963 = vmatprep.subr.msk.mxu0 %vm392_vm0, %v383_v23 }
  0x3a   : > { %998 = vmatprep.subr.msk.mxu1 %vm392_vm0, %v365_v24 }
  0x3c   : > { %964 = vmatpush3.xpose.msk.msra.mxu0 %vm392_vm0, %v383_v23 }
  0x3d   : > { %999 = vmatpush3.xpose.msk.msra.mxu1 %vm392_vm0, %v365_v24  ;;  %965 = vmatprep.subr.msk.mxu0 %vm392_vm0, %v382_v25 }
  0x3e   : > { %1000 = vmatprep.subr.msk.mxu1 %vm392_vm0, %v364_v26 }
  0x40   : > { %966 = vmatpush3.xpose.msk.msra.mxu0 %vm392_vm0, %v382_v25 }
  0x41   : > { %1001 = vmatpush3.xpose.msk.msra.mxu1 %vm392_vm0, %v364_v26  ;;  %967 = vmatprep.subr.msk.mxu0 %vm392_vm0, %v381_v27 }
  0x42   : > { %1002 = vmatprep.subr.msk.mxu1 %vm392_vm0, %v363_v28 }
  0x44   : > { %968 = vmatpush3.xpose.msk.msra.mxu0 %vm392_vm0, %v381_v27 }
  0x45   : > { %1003 = vmatpush3.xpose.msk.msra.mxu1 %vm392_vm0, %v363_v28  ;;  %969 = vmatprep.subr.msk.mxu0 %vm392_vm0, %v380_v29 }
  0x46   : > { %1004 = vmatprep.subr.msk.mxu1 %vm392_vm0, %v362_v30 }
  0x48   : > { %970 = vmatpush3.xpose.msk.msra.mxu0 %vm392_vm0, %v380_v29 }
  0x49   : > { %1005 = vmatpush3.xpose.msk.msra.mxu1 %vm392_vm0, %v362_v30  ;;  %971 = vmatprep.subr.msk.mxu0 %vm392_vm0, %v379_v31 }
  0x4a   : > { %1006 = vmatprep.subr.msk.mxu1 %vm392_vm0, %v361_v32 }
  0x4c   : > { %972 = vmatpush3.xpose.msk.msra.mxu0 %vm392_vm0, %v379_v31 }
  0x4d   : > { %1007 = vmatpush3.xpose.msk.msra.mxu1 %vm392_vm0, %v361_v32  ;;  %973 = vmatprep.subr.msk.mxu0 %vm392_vm0, %v378_v33 }
  0x4e   : > { %1008 = vmatprep.subr.msk.mxu1 %vm392_vm0, %v360_v34 }
  0x50   : > { %974 = vmatpush3.xpose.msk.msra.mxu0 %vm392_vm0, %v378_v33 }
  0x51   : > { %1009 = vmatpush3.xpose.msk.msra.mxu1 %vm392_vm0, %v360_v34  ;;  %975 = vmatprep.subr.msk.mxu0 %vm392_vm0, %v377_v35 }
  0x52   : > { %1010 = vmatprep.subr.msk.mxu1 %vm392_vm0, %v359_v36 }
  0x54   : > { %976 = vmatpush3.xpose.msk.msra.mxu0 %vm392_vm0, %v377_v35 }
  0x55   : > { %1011 = vmatpush3.xpose.msk.msra.mxu1 %vm392_vm0, %v359_v36  ;;  %977 = vmatprep.subr.msk.mxu0 %vm392_vm0, %v376_v37 }
  0x56   : > { %1012 = vmatprep.subr.msk.mxu1 %vm392_vm0, %v358_v38 }
  0x58   : > { %978 = vmatpush3.xpose.msk.msra.mxu0 %vm392_vm0, %v376_v37 }
  0x59   : > { %1013 = vmatpush3.xpose.msk.msra.mxu1 %vm392_vm0, %v358_v38  ;;  %1017 = vmatprep.subr.mxu0 %v1135_v41 }
  0x5b   : > { %980 = vmatmul.mubr.msk.f32.vlgmr.msra.gmra.mxu0 %vm392_vm0, %v375_v39 }
  0x5c   : > { %1015 = vmatmul.mubr.msk.f32.vlgmr.msra.gmra.mxu1 %vm392_vm0, %v357_v40  ;;  %1021 = vmatprep.mubr.msk.f32.mxu0 %vm1136_vm1, %v1135_v41 }
  0x94   : > { %v661_v44 = vpop.permute.xlu0 %660 }
  0x98   : > { %v656_v52 = vpop.permute.xlu0 %655 }
  0x9c   : > { %v765_v7 = vpop.permute.xlu0 %764 }
  0x9d   : > { %v770_v9 = vrot.slane %v765_v7, %v769_v5 }
  0xa2   : > { %v672_v57 = vpop.permute.xlu1 %671 }
  0xa6   : > { %v752_v62 = vpop.permute.xlu1 %751 }
 0x11b   : > { %v981_v45 = vpop.f32.mrf.mxu0 }
 0x11c   : > { %v1016_v46 = vpop.f32.mrf.mxu1 }
 0x11d   : > { %v648_v47 = vadd.f32 %v1016_v46, %v981_v45  ;;  %v513_v48 = vpop.f32.mrf.mxu0 }
 0x11e   : > { %v642_v49 = vpop.f32.mrf.mxu1 }
 0x11f   : > { %v664_v50 = vadd.f32 %v661_v44, %v648_v47  ;;  %v643_v51 = vadd.f32 %v642_v49, %v513_v48 }
 0x121   : > { %v666_v53 = vmax.f32 %v664_v50, 0.0  ;;  %v663_v54 = vadd.f32 %v656_v52, %v643_v51 }
 0x123   : > { %v665_v55 = vmax.f32 %v663_v54, 0.0  ;;  %1018 = vmatpush3.msra.mxu0 %v666_v53 }
 0x124   : > { %1019 = vmatprep.subr.mxu0 %v1135_v41 }
 0x125   : > { %1020 = vmatpush3.msra.mxu0 %v665_v55 }
 0x126   : > { %1022 = vmatmul.mubr.msk.f32.vlgmr.msra.gmra.mxu0 %vm392_vm0, %v667_v56 }
 0x1e6   : > { %v743_v58 = vpop.f32.mrf.mxu0 }
 0x1e7   : > { %v744_v59 = vadd.f32 %v743_v58, %v672_v57 }
 0x1e8   : > { %v1023_v60 = vpop.f32.mrf.mxu0 }
 0x1e9   : > { %v747_v61 = vmax.f32 %v744_v59, 0.0 }
 0x1eb   : > { %v754_v0 = vmul.f32 %v752_v62, %v747_v61 }
 0x1ed   : > { %v755_v1 = vrot.slane %v754_v0, 4 }
 0x1ef   : > { %v756_v3 = vadd.f32 %v755_v1, %v754_v0 }
 0x1f1   : > { %v757_v4 = vrot.slane %v756_v3, 2 }
 0x1f3   : > { %v758_v6 = vadd.f32 %v757_v4, %v756_v3 }
 0x1f5   : > { %v759_v8 = vrot.slane %v758_v6, 1 }
 0x1f7   : > { %v760_v10 = vadd.f32 %v759_v8, %v758_v6 }
 0x1f9   : > { %v771_v11 = vadd.f32 %v770_v9, %v760_v10 }
 0x1fb   : > { %v904_v12 = vmul.f32 -1.442695, %v771_v11 }
 0x1fd   : > { %1068 = vpow2.f32 %v904_v12 }
 0x20a   : > { %v1069_v13 = vpop.eup %1068 }
 0x20b   : > { %v775_v14 = vadd.f32 1.0, %v1069_v13 }
 0x20d   : > { %1070 = vrcp.f32 %v775_v14 }
 0x21a   : > { %v1071_v15 = vpop.eup %1070 }
 0x21b   : > { %778 = vst [vmem:[%s343_s24] sm:$0x1] %v1071_v15 }
 0x21c   : > { %1085 = shalt.err (!%p1082_p3)
}
 0x21d   : > { %s1086_s22 = scalar_lea.hbm %s1383_s28, 16  ;;  %s1090_s23 = scalar_lea.hbm %s1427_s9, 48 }
 0x21e   : > { %p1087_p4 = scmp.ne.s32.totalorder %s1383_s28, %s1086_s22  ;;  %p1091_p9 = scmp.lt.s32.totalorder %s1383_s28, %s1427_s9 }
 0x21f   : > { %p1092_p10 = scmp.lt.s32.totalorder %s1090_s23, %s1086_s22 }
 0x220   : > { %p1088_p7 = pnand %p1087_p4, %p1226_p5 }
 0x221   : > { %p1093_p11 = por %p1092_p10, %p1091_p9 }
 0x222   : > { %p1089_p8 = pneg %p1088_p7 }
 0x224   : > { %p1094_p12 = pnand %p1093_p11, %p1089_p8 }
 0x226   : > { %1097 = shalt.err (!%p1094_p12)
}
 0x227   : > { %1024 = dma.vmem_to_hbm [thread:$0]  (%p1226_p5), %s793_s25, 16, %s1383_s28, %s780_s29  }
 0x228 PF: > { %p1030_p13 = scmp.ge.s32.totalorder %s1132_s14, 2  ;;  %s804_s27 = sand.u32 1, %s1120_s11  }
 0x229   : > { %s805_s30 = scalar_lea.sflag [#allocation4], %s804_s27 }
 0x22a   : > { %p1027_p0 = pnand %p1030_p13, %p1230_p6 }
 0x22c   : > { %p1028_p1 = pneg %p1027_p0 }
 0x22e   : > { %1115 = dma.done.wait (%p1028_p1), %s805_s30, 16  }
 0x22f   : > { %1117 = vsyncadd (%p1028_p1), %s805_s30, 4294967280  ;;  %p21_p2 = scmp.ge.s32.totalorder %s1214_s16, 5   ;;  %s1430_s11 = smov %s1124_s12 }
 0x230   : > { %s1431_s12 = smov %s1128_s13  ;;  %s1432_s13 = smov %s1224_s19 }
 0x231   : > { %s1433_s14 = smov %s1214_s16  ;;  %23 = sbr.rel (!%p21_p2) target bundleno = 6 (0x6), region = 94 }
 0x236   :  { %809 = vsyncpa [#allocation4], 1 }
 0x237   :  { %811 = vsyncpa [#allocation4 + $0x1], 1 }

</bundles_post_ra>
